<compile_context>
chip_gen: v7x
topology: tpu7x:2x2x1
jax: 0.10.0
libtpu: 0.0.40
codegen_flags: <defaults>
</compile_context>

<pallas_src>
import functools
import math

import jax
import jax.numpy as jnp
from jax.experimental import pallas as pl
from jax.experimental.pallas import tpu as pltpu


def _ceil_to(x, m):
    return ((x + m - 1) // m) * m


def _focal_loss_kernel(logits_ref, labels_ref, loss_ref, *, alpha, gamma,
                       n_valid, tm, n_classes):
    i = pl.program_id(0)

    x = logits_ref[...].astype(jnp.float32)           # (tm, C)
    labels = labels_ref[...]                          # (tm, 1) int32

    # In-kernel "one-hot": iota/compare instead of a materialized (N, C)
    # float one-hot in HBM.
    class_ids = jax.lax.broadcasted_iota(jnp.int32, (tm, n_classes), 1)
    tgt_mask = class_ids == labels                    # (tm, C) bool

    # Numerically-stable target log-prob via log-sum-exp:
    #   log p_t = (x_t - m) - log(sum_j exp(x_j - m))
    m = jnp.max(x, axis=1, keepdims=True)             # (tm, 1)
    e = jnp.exp(x - m)                                # (tm, C), single EUP pass
    denom = jnp.sum(e, axis=1, keepdims=True)         # (tm, 1)
    x_t = jnp.sum(jnp.where(tgt_mask, x, 0.0), axis=1, keepdims=True)

    log_pt = (x_t - m) - jnp.log(denom)               # (tm, 1), <= 0
    p_t = jnp.exp(log_pt)

    # clamp(min=1e-7) as in the reference; reuse log_pt to avoid a second log.
    clamp_val = 1e-7
    p_t_c = jnp.maximum(p_t, clamp_val)
    neg_log_p = jnp.where(p_t < clamp_val,
                          jnp.float32(-math.log(clamp_val)), -log_pt)

    focal = 1.0 - p_t_c
    # gamma is a Python constant: small integer powers -> mul chain (no EUP pow)
    g = float(gamma)
    if g == 0.0:
        w = jnp.ones_like(focal)
    elif g.is_integer() and 1.0 <= g <= 8.0:
        w = focal
        for _ in range(int(g) - 1):
            w = w * focal
    else:
        w = focal ** g

    loss = (alpha * w) * neg_log_p                    # (tm, 1)

    # Mask rows that are padding (N rounded up to a multiple of tm).
    row = jax.lax.broadcasted_iota(jnp.int32, (tm, 1), 0) + i * tm
    loss = jnp.where(row < n_valid, loss, 0.0)

    loss_ref[...] = loss.astype(loss_ref.dtype)


def multiclass_focal_loss(inputs, targets, alpha=1.0, gamma=2.0,
                          reduction="mean", tm=None):
    """inputs: (N, C) logits; targets: (N,) int class ids or (N, C) one-hot."""
    N, C = inputs.shape

    if targets.ndim != 1:
        # TODO(synk): soft (non-one-hot) 2-D targets are reduced to hard labels
        # here; the torch module would use them as-is.
        targets = jnp.argmax(targets, axis=1)
    labels = targets.astype(jnp.int32).reshape(N, 1)

    if tm is None:
        # ~4 MiB per logits tile (double-buffered => ~8 MiB of VMEM, safe on
        # v5e/v6e/v7x scoped defaults), capped at 1024 rows; multiple of 16
        # keeps bf16 sublane packing happy too.
        tm = max(16, min(1024, (4 << 20) // max(C * 4, 1)))
    tm = _ceil_to(max(int(tm), 8), 8)
    tm = min(tm, _ceil_to(N, 8))

    n_pad = _ceil_to(N, tm)
    if n_pad != N:
        inputs = jnp.pad(inputs, ((0, n_pad - N), (0, 0)))
        labels = jnp.pad(labels, ((0, n_pad - N), (0, 0)))

    grid = (n_pad // tm,)
    kernel = functools.partial(
        _focal_loss_kernel,
        alpha=float(alpha),
        gamma=float(gamma),
        n_valid=N,
        tm=tm,
        n_classes=C,
    )

    per_row = pl.pallas_call(
        kernel,
        out_shape=jax.ShapeDtypeStruct((n_pad, 1), jnp.float32),
        grid_spec=pltpu.PrefetchScalarGridSpec(
            num_scalar_prefetch=0,
            grid=grid,
            in_specs=[
                pl.BlockSpec((tm, C), lambda i: (i, 0)),  # logits row tile
                pl.BlockSpec((tm, 1), lambda i: (i, 0)),  # int32 labels tile
            ],
            out_specs=pl.BlockSpec((tm, 1), lambda i: (i, 0)),
        ),
        compiler_params=pltpu.CompilerParams(
            # Row blocks are fully independent -> megacore split on v7x.
            dimension_semantics=("parallel",),
        ),
    )(inputs, labels)

    total = jnp.sum(per_row)
    if reduction == "sum":
        return total
    if reduction == "mean":
        return total / N
    return per_row[:N, 0]  # unreduced fallback (matches torch's else branch)


def _reference(inputs, targets, alpha=1.0, gamma=2.0, reduction="mean"):
    if targets.ndim == 1:
        targets = jax.nn.one_hot(targets, inputs.shape[1], dtype=jnp.float32)
    probs = jax.nn.softmax(inputs.astype(jnp.float32), axis=1)
    p_t = jnp.maximum(jnp.sum(probs * targets, axis=1), 1e-7)
    loss = alpha * (1.0 - p_t) ** gamma * (-jnp.log(p_t))
    if reduction == "sum":
        return jnp.sum(loss)
    return jnp.mean(loss)


if __name__ == "__main__":
    key = jax.random.PRNGKey(0)
    k1, k2 = jax.random.split(key)

    N, C = 32, 16
    logits = jax.random.normal(k1, (N, C), dtype=jnp.float32)
    labels = jax.random.randint(k2, (N,), 0, C, dtype=jnp.int32)

    for reduction in ("mean", "sum"):
        loss = multiclass_focal_loss(logits, labels, alpha=1.0, gamma=2.0,
                                     reduction=reduction)
        loss = jax.block_until_ready(loss)
        ref = _reference(logits, labels, alpha=1.0, gamma=2.0,
                         reduction=reduction)
        assert jnp.allclose(loss, ref, rtol=1e-5, atol=1e-6), \
            (reduction, loss, ref)

    print("KERNEL_OK")
</pallas_src>

<mosaic_0001>
module attributes {stable_mosaic.version = 11 : i64} {
  func.func @_focal_loss_kernel(%arg0: i32, %arg1: memref<32x16xf32, #tpu.memory_space<vmem>>, %arg2: memref<32x1xi32, #tpu.memory_space<vmem>>, %arg3: memref<32x1xf32, #tpu.memory_space<vmem>>) attributes {dimension_semantics = [#tpu.dimension_semantics<parallel>], iteration_bounds = array<i64: 1>, scalar_prefetch = 0 : i64, scratch_operands = 0 : i64, tpu.core_type = #tpu.core_type<tc>, window_params = [{transform_indices = @transform_0, window_bounds = array<i64: 32, 16>}, {transform_indices = @transform_1, window_bounds = array<i64: 32, 1>}, {transform_indices = @transform_2, window_bounds = array<i64: 32, 1>}]} {
    %c0 = arith.constant 0 : index
    %c0_0 = arith.constant 0 : index
    %0 = vector.load %arg1[%c0, %c0_0] : memref<32x16xf32, #tpu.memory_space<vmem>>, vector<32x16xf32>
    %c0_1 = arith.constant 0 : index
    %c0_2 = arith.constant 0 : index
    %1 = vector.load %arg2[%c0_1, %c0_2] : memref<32x1xi32, #tpu.memory_space<vmem>>, vector<32x1xi32>
    %2 = tpu.iota {dimensions = array<i32: 1>} : vector<32x16xi32>
    %3 = vector.broadcast %1 : vector<32x1xi32> to vector<32x16xi32>
    %4 = arith.cmpi eq, %2, %3 : vector<32x16xi32>
    %cst = arith.constant dense<0xFF800000> : vector<32xf32>
    %5 = vector.multi_reduction <maximumf>, %0, %cst [1] : vector<32x16xf32> to vector<32xf32>
    %6 = vector.shape_cast %5 : vector<32xf32> to vector<32x1xf32>
    %7 = vector.broadcast %6 : vector<32x1xf32> to vector<32x16xf32>
    %8 = arith.subf %0, %7 : vector<32x16xf32>
    %9 = math.exp %8 : vector<32x16xf32>
    %cst_3 = arith.constant dense<0.000000e+00> : vector<32xf32>
    %10 = vector.multi_reduction <add>, %9, %cst_3 [1] : vector<32x16xf32> to vector<32xf32>
    %11 = vector.shape_cast %10 : vector<32xf32> to vector<32x1xf32>
    %cst_4 = arith.constant 0.000000e+00 : f32
    %12 = vector.broadcast %cst_4 : f32 to vector<32x16xf32>
    %13 = arith.select %4, %0, %12 : vector<32x16xi1>, vector<32x16xf32>
    %cst_5 = arith.constant dense<0.000000e+00> : vector<32xf32>
    %14 = vector.multi_reduction <add>, %13, %cst_5 [1] : vector<32x16xf32> to vector<32xf32>
    %15 = vector.shape_cast %14 : vector<32xf32> to vector<32x1xf32>
    %16 = arith.subf %15, %6 : vector<32x1xf32>
    %17 = math.log %11 : vector<32x1xf32>
    %18 = arith.subf %16, %17 : vector<32x1xf32>
    %19 = math.exp %18 : vector<32x1xf32>
    %cst_6 = arith.constant 1.000000e-07 : f32
    %20 = vector.broadcast %cst_6 : f32 to vector<32x1xf32>
    %21 = arith.maximumf %19, %20 : vector<32x1xf32>
    %cst_7 = arith.constant 1.000000e-07 : f32
    %22 = vector.broadcast %cst_7 : f32 to vector<32x1xf32>
    %23 = arith.cmpf olt, %19, %22 : vector<32x1xf32>
    %cst_8 = arith.constant 0.000000e+00 : f32
    %24 = vector.broadcast %cst_8 : f32 to vector<32x1xf32>
    %25 = arith.subf %24, %18 : vector<32x1xf32>
    %cst_9 = arith.constant 16.1180954 : f32
    %26 = vector.broadcast %cst_9 : f32 to vector<32x1xf32>
    %27 = arith.select %23, %26, %25 : vector<32x1xi1>, vector<32x1xf32>
    %cst_10 = arith.constant 1.000000e+00 : f32
    %28 = vector.broadcast %cst_10 : f32 to vector<32x1xf32>
    %29 = arith.subf %28, %21 : vector<32x1xf32>
    %30 = arith.mulf %29, %29 : vector<32x1xf32>
    %cst_11 = arith.constant 1.000000e+00 : f32
    %31 = vector.broadcast %cst_11 : f32 to vector<32x1xf32>
    %32 = arith.mulf %31, %30 : vector<32x1xf32>
    %33 = arith.mulf %32, %27 : vector<32x1xf32>
    %34 = tpu.iota {dimensions = array<i32: 0>} : vector<32x1xi32>
    %c32_i32 = arith.constant 32 : i32
    %35 = arith.muli %arg0, %c32_i32 : i32
    %36 = vector.broadcast %35 : i32 to vector<32x1xi32>
    %37 = arith.addi %34, %36 : vector<32x1xi32>
    %c32_i32_12 = arith.constant 32 : i32
    %38 = vector.broadcast %c32_i32_12 : i32 to vector<32x1xi32>
    %39 = arith.cmpi slt, %37, %38 : vector<32x1xi32>
    %cst_13 = arith.constant 0.000000e+00 : f32
    %40 = vector.broadcast %cst_13 : f32 to vector<32x1xf32>
    %41 = arith.select %39, %33, %40 : vector<32x1xi1>, vector<32x1xf32>
    %c0_14 = arith.constant 0 : index
    %c0_15 = arith.constant 0 : index
    %42 = vector.load %arg3[%c0_14, %c0_15] : memref<32x1xf32, #tpu.memory_space<vmem>>, vector<32x1xf32>
    tpu.vector_store %arg3[%c0_14, %c0_15], %41 {strides = array<i32>} : memref<32x1xf32, #tpu.memory_space<vmem>>, vector<32x1xf32>,
    return
  }
  func.func @transform_0(%arg0: i32) -> (i32, i32) {
    %c0_i32 = arith.constant 0 : i32
    %c0_i32_0 = arith.constant 0 : i32
    return %arg0, %c0_i32 : i32, i32
  }
  func.func @transform_1(%arg0: i32) -> (i32, i32) {
    %c0_i32 = arith.constant 0 : i32
    %c0_i32_0 = arith.constant 0 : i32
    return %arg0, %c0_i32 : i32, i32
  }
  func.func @transform_2(%arg0: i32) -> (i32, i32) {
    %c0_i32 = arith.constant 0 : i32
    %c0_i32_0 = arith.constant 0 : i32
    return %arg0, %c0_i32 : i32, i32
  }
}

</mosaic_0001>

<bundles_post_ra>
// kernel: tpu_custom_call.1
= control target key start
LH: loop header
LB: loop body
LE: loop exit
PB: predicated region body
PF: predicated region fallthrough
CT: control target
= control target key end

     0   :  { %vm37_vm0 = vcmask 130048   ;;  %v197_v3 = vmov 0   ;;  %v19_v25 = vlaneseq  ;;  %vm161_vm6 = vcmask 7168   ;;  %s291_s0 = inlined_call_operand.vmem [shape: f32[32,16], index: 0, kind: input, shape index: {}]   ;;  %s292_s1 = inlined_call_operand.vmem [shape: s32[32,1], index: 1, kind: input, shape index: {}]   ;;  %s293_s2 = inlined_call_operand.vmem [shape: f32[32,1], index: 2, kind: output, shape index: {}]  }
   0x1   :  { %v11_v0 = vld [vmem:[%s291_s0] sm:$0xff]  ;;  %v13_v1 = vld [vmem:[%s291_s0 + $0x10] sm:$0xff]  ;;  %v222_v2 = vld [vmem:[%s291_s0 + $0x8] sm:$0xff]  ;;  %172 = vset.pattern.permute.xlu1 %v197_v3  ;;  %171 = vset.pattern.permute.xlu0 %v197_v3 }
   0x2   :  { %v38_v4 = vsel %vm37_vm0, %v11_v0, -inf  ;;  %v44_v5 = vsel %vm37_vm0, %v13_v1, -inf  ;;  %v229_v6 = vld [vmem:[%s291_s0 + $0x18] sm:$0xff]  ;;  %v41_v7 = vsel %vm37_vm0, %v222_v2, -inf  ;;  %v16_v9 = vld [vmem:[%s292_s1 + $0x8] sm:$0xff]  ;;  %v17_v10 = vld [vmem:[%s292_s1 + $0x10] sm:$0xff] }
   0x3   :  { %39 = vmax.xlane.f32.xlu0 %v38_v4  ;;  %45 = vmax.xlane.f32.xlu1 %v44_v5  ;;  %v47_v8 = vsel %vm37_vm0, %v229_v6, -inf  ;;  %v15_v11 = vld [vmem:[%s292_s1] sm:$0xff]  ;;  %v18_v12 = vld [vmem:[%s292_s1 + $0x18] sm:$0xff]  ;;  %v20_v27 = vand.u32 127, %v19_v25 }
   0x7   :  { %42 = vmax.xlane.f32.xlu0 %v41_v7  ;;  %48 = vmax.xlane.f32.xlu1 %v47_v8 }
  0x18   :  { %25 = vperm.xlu1 %172, %v16_v9  }
  0x1c   :  { %28 = vperm.xlu1 %172, %v17_v10  }
  0x1d   :  { %22 = vperm.xlu0 %171, %v15_v11  }
  0x20   :  { %31 = vperm.xlu1 %172, %v18_v12  }
  0x90   :  { %v247_v13 = vpop.xlane.xlu0 %39  ;;  %v249_v14 = vpop.xlane.xlu1 %45 }
  0x91   :  { %v50_v15 = vsub.f32 %v11_v0, %v247_v13  ;;  %v52_v16 = vsub.f32 %v13_v1, %v249_v14 }
  0x93   :  { %v54_v17 = vmul.f32 1.442695, %v50_v15  ;;  %v58_v18 = vmul.f32 1.442695, %v52_v16 }
  0x94   :  { %v253_v19 = vpop.xlane.xlu0 %42  ;;  %v255_v20 = vpop.xlane.xlu1 %48 }
  0x95   :  { %173 = vpow2.f32 %v54_v17  ;;  %v51_v21 = vsub.f32 %v222_v2, %v253_v19  ;;  %v53_v22 = vsub.f32 %v229_v6, %v255_v20 }
  0x96   :  { %175 = vpow2.f32 %v58_v18 }
  0x97   :  { %v56_v23 = vmul.f32 1.442695, %v51_v21  ;;  %v60_v24 = vmul.f32 1.442695, %v53_v22 }
  0x98   :  { %v26_v26 = vpop.permute.xlu1 %25 }
  0x99   :  { %177 = vpow2.f32 %v56_v23  ;;  %vm34_vm3 = vcmp.eq.s32.totalorder %v20_v27, %v26_v26 }
  0x9a   :  { %179 = vpow2.f32 %v60_v24  ;;  %v75_v43 = vsel %vm34_vm3, %v222_v2, 0.0 }
  0x9b   :  { %v81_v44 = vsel %vm37_vm0, %v75_v43, 0.0 }
  0x9c   :  { %v29_v28 = vpop.permute.xlu1 %28  ;;  %v23_v32 = vpop.permute.xlu0 %22 }
  0x9d   :  { %vm35_vm1 = vcmp.eq.s32.totalorder %v20_v27, %v29_v28  ;;  %vm33_vm2 = vcmp.eq.s32.totalorder %v20_v27, %v23_v32 }
  0x9e   :  { %v76_v35 = vsel %vm35_vm1, %v13_v1, 0.0  ;;  %v74_v40 = vsel %vm33_vm2, %v11_v0, 0.0 }
  0x9f   :  { %v174_v29 = vpop.eup %173  ;;  %v84_v39 = vsel %vm37_vm0, %v76_v35, 0.0  ;;  %v78_v41 = vsel %vm37_vm0, %v74_v40, 0.0 }
  0xa0   :  { %v176_v30 = vpop.eup %175  ;;  %v62_v31 = vsel %vm37_vm0, %v174_v29, 0.0  ;;  %v32_v42 = vpop.permute.xlu1 %31 }
  0xa1   :  { %63 = vadd.xlane.f32.xlu1 %v62_v31  ;;  %v68_v33 = vsel %vm37_vm0, %v176_v30, 0.0  ;;  %vm36_vm4 = vcmp.eq.s32.totalorder %v20_v27, %v32_v42 }
  0xa2   :  { %v77_v45 = vsel %vm36_vm4, %v229_v6, 0.0 }
  0xa3   :  { %v178_v34 = vpop.eup %177  ;;  %v87_v46 = vsel %vm37_vm0, %v77_v45, 0.0 }
  0xa4   :  { %v180_v36 = vpop.eup %179  ;;  %v65_v37 = vsel %vm37_vm0, %v178_v34, 0.0 }
  0xa5   :  { %69 = vadd.xlane.f32.xlu1 %v68_v33  ;;  %66 = vadd.xlane.f32.xlu0 %v65_v37  ;;  %v71_v38 = vsel %vm37_vm0, %v180_v36, 0.0 }
  0xa9   :  { %72 = vadd.xlane.f32.xlu1 %v71_v38  ;;  %85 = vadd.xlane.f32.xlu0 %v84_v39 }
  0xad   :  { %79 = vadd.xlane.f32.xlu1 %v78_v41 }
  0xb1   :  { %82 = vadd.xlane.f32.xlu1 %v81_v44 }
  0xb5   :  { %88 = vadd.xlane.f32.xlu1 %v87_v46 }
 0x12e   :  { %v64_v47 = vpop.xlane.xlu1 %63 }
 0x12f   :  { %181 = vlog2.f32 %v64_v47 }
 0x132   :  { %v70_v48 = vpop.xlane.xlu1 %69  ;;  %v67_v49 = vpop.xlane.xlu0 %66 }
 0x133   :  { %183 = vlog2.f32 %v70_v48 }
 0x134   :  { %185 = vlog2.f32 %v67_v49 }
 0x136   :  { %v73_v50 = vpop.xlane.xlu1 %72  ;;  %v86_v54 = vpop.xlane.xlu0 %85 }
 0x137   :  { %187 = vlog2.f32 %v73_v50  ;;  %v92_v60 = vsub.f32 %v86_v54, %v249_v14 }
 0x139   :  { %v182_v51 = vpop.eup %181 }
 0x13a   :  { %v95_v52 = vmul.f32 0.6931472, %v182_v51  ;;  %v80_v53 = vpop.xlane.xlu1 %79 }
 0x13b   :  { %v90_v55 = vsub.f32 %v80_v53, %v247_v13 }
 0x13d   :  { %v184_v56 = vpop.eup %183  ;;  %v102_v57 = vsub.f32 %v90_v55, %v95_v52 }
 0x13e   :  { %v186_v58 = vpop.eup %185  ;;  %v99_v59 = vmul.f32 0.6931472, %v184_v56  ;;  %v83_v61 = vpop.xlane.xlu1 %82 }
 0x13f   :  { %v97_v62 = vmul.f32 0.6931472, %v186_v58  ;;  %v106_v63 = vmul.f32 1.442695, %v102_v57  ;;  %v91_v0 = vsub.f32 %v83_v61, %v253_v19  ;;  %v122_v17 = vsub.f32 0.0, %v102_v57 }
 0x140   :  { %v104_v1 = vsub.f32 %v92_v60, %v99_v59 }
 0x141   :  { %v188_v2 = vpop.eup %187  ;;  %189 = vpow2.f32 %v106_v63  ;;  %v103_v3 = vsub.f32 %v91_v0, %v97_v62 }
 0x142   :  { %v101_v4 = vmul.f32 0.6931472, %v188_v2  ;;  %v110_v5 = vmul.f32 1.442695, %v104_v1  ;;  %v89_v6 = vpop.xlane.xlu1 %88 }
 0x143   :  { %v108_v7 = vmul.f32 1.442695, %v103_v3  ;;  %v93_v8 = vsub.f32 %v89_v6, %v255_v20  ;;  %v124_v20 = vsub.f32 0.0, %v104_v1  ;;  %v123_v27 = vsub.f32 0.0, %v103_v3 }
 0x144   :  { %191 = vpow2.f32 %v110_v5 }
 0x145   :  { %193 = vpow2.f32 %v108_v7  ;;  %v105_v9 = vsub.f32 %v93_v8, %v101_v4 }
 0x147   :  { %v112_v10 = vmul.f32 1.442695, %v105_v9  ;;  %v125_v35 = vsub.f32 0.0, %v105_v9 }
 0x149   :  { %195 = vpow2.f32 %v112_v10 }
 0x14b   :  { %v190_v11 = vpop.eup %189 }
 0x14c   :  { %v114_v12 = vmax.f32 %v190_v11, 1e-07  ;;  %vm118_vm5 = vcmp.lt.f32.partialorder %v190_v11, 1e-07 }
 0x14d   :  { %v126_v22 = vsel %vm118_vm5, 16.118095, %v122_v17 }
 0x14e   :  { %v192_v13 = vpop.eup %191  ;;  %v130_v14 = vsub.f32 1.0, %v114_v12 }
 0x14f   :  { %v194_v15 = vpop.eup %193  ;;  %v116_v16 = vmax.f32 %v192_v13, 1e-07  ;;  %vm120_vm7 = vcmp.lt.f32.partialorder %v192_v13, 1e-07 }
 0x150   :  { %v134_v18 = vmul.f32 %v130_v14, %v130_v14  ;;  %v115_v19 = vmax.f32 %v194_v15, 1e-07  ;;  %vm119_vm8 = vcmp.lt.f32.partialorder %v194_v15, 1e-07  ;;  %v128_v28 = vsel %vm120_vm7, 16.118095, %v124_v20 }
 0x151   :  { %v132_v21 = vsub.f32 1.0, %v116_v16  ;;  %v127_v32 = vsel %vm119_vm8, 16.118095, %v123_v27 }
 0x152   :  { %v138_v23 = vmul.f32 %v134_v18, %v126_v22  ;;  %v131_v24 = vsub.f32 1.0, %v115_v19 }
 0x153   :  { %v196_v25 = vpop.eup %195  ;;  %v136_v26 = vmul.f32 %v132_v21, %v132_v21 }
 0x154   :  { %162 = vst.msk [vmem:[%s293_s2] sm:$0xff] %vm161_vm6, %v138_v23  ;;  %v135_v29 = vmul.f32 %v131_v24, %v131_v24  ;;  %v117_v30 = vmax.f32 %v196_v25, 1e-07  ;;  %vm121_vm9 = vcmp.lt.f32.partialorder %v196_v25, 1e-07 }
 0x155   :  { %v140_v31 = vmul.f32 %v136_v26, %v128_v28  ;;  %v129_v37 = vsel %vm121_vm9, 16.118095, %v125_v35 }
 0x156   :  { %v139_v33 = vmul.f32 %v135_v29, %v127_v32  ;;  %v133_v34 = vsub.f32 1.0, %v117_v30 }
 0x157   :  { %164 = vst.msk [vmem:[%s293_s2 + $0x10] sm:$0xff] %vm161_vm6, %v140_v31 }
 0x158   :  { %163 = vst.msk [vmem:[%s293_s2 + $0x8] sm:$0xff] %vm161_vm6, %v139_v33  ;;  %v137_v36 = vmul.f32 %v133_v34, %v133_v34 }
 0x15a   :  { %v141_v38 = vmul.f32 %v137_v36, %v129_v37 }
 0x15c   :  { %165 = vst.msk [vmem:[%s293_s2 + $0x18] sm:$0xff] %vm161_vm6, %v141_v38 }

</bundles_post_ra>
